<compile_context>
chip_gen: v5e
topology: v5e:2x2
jax: 0.10.0
libtpu: 0.0.40
codegen_flags: <defaults>
</compile_context>

<pallas_src>
import functools

import jax
import jax.numpy as jnp
from jax import lax
from jax.experimental import pallas as pl
from jax.experimental.pallas import tpu as pltpu


def _utility_topk_kernel(loc_ref, idxs_ref, *, n_valid, K):
    """score = expectation(Normal(loc, scale)) = loc; write top-K indices.

    loc_ref  : (R, 128) f32 in VMEM — candidate axis flattened row-major,
               fully sublane+lane dense; slots >= n_valid are padding.
    idxs_ref : (1, K) i32 output — ranked indices (descending score).
    """
    R = loc_ref.shape[0]
    n_slots = R * 128

    row_iota = lax.broadcasted_iota(jnp.int32, (R, 128), 0)
    col_iota = lax.broadcasted_iota(jnp.int32, (R, 128), 1)
    flat_iota = row_iota * 128 + col_iota          # flat candidate id per slot
    k_iota = lax.broadcasted_iota(jnp.int32, (1, K), 1)

    # Working copy lives entirely in vregs (no VMEM scratch round-trips).
    # One select masks both pad slots and NaNs to -inf so they are never picked.
    w = loc_ref[...]
    w = jnp.where(jnp.logical_or(flat_iota >= n_valid, jnp.isnan(w)),
                  -jnp.inf, w)

    def body(k, state):
        w, idxs_acc = state
        # max over lanes then sublanes -> (1, 1)
        m = jnp.max(jnp.max(w, axis=1, keepdims=True), axis=0, keepdims=True)
        # smallest flat index attaining the max (lax.top_k-compatible ties)
        hit = jnp.where(w == m, flat_iota, n_slots)
        idx = jnp.min(jnp.min(hit, axis=1, keepdims=True), axis=0, keepdims=True)
        idxs_acc = jnp.where(k_iota == k, idx, idxs_acc)
        # knock out the winner for the next round
        w = jnp.where(flat_iota == idx, -jnp.inf, w)
        return w, idxs_acc

    idxs0 = jnp.zeros((1, K), jnp.int32)
    if K <= 8:
        # Small static K: plain unroll (LLO sees the whole schedule).
        state = (w, idxs0)
        for k in range(K):
            state = body(k, state)
        _, idxs_acc = state
    else:
        # Large K: bounded vreg live ranges / compile time.
        _, idxs_acc = lax.fori_loop(0, K, body, (w, idxs0))

    idxs_ref[...] = idxs_acc


def utility_function_policy(loc, scale=None, acquisition_size: int = 1):
    """JAX/Pallas equivalent of UtilityFunction.forward.

    loc, scale: (N,) parameters of the Normal predictive distribution.
    Returns:    (K,) int32 ranked indices, K = min(acquisition_size, N).
    """
    # expectation(Normal(loc, scale)) == loc -> scale is never used; keep it
    # out of the kernel entirely (no pad, no in_spec, no DMA).
    del scale

    N = int(loc.shape[0])
    # `if len(score) < self.acquisition_size: self.acquisition_size = len(score)`
    K = min(int(acquisition_size), N)
    if K <= 0:
        return jnp.zeros((0,), jnp.int32)

    # Sublane+lane dense layout: (R, 128), R a multiple of 8.
    R = max(8, ((pl.cdiv(N, 128) + 7) // 8) * 8)
    n_slots = R * 128
    loc_f = loc.astype(jnp.float32).reshape(-1)
    pad = n_slots - N
    if pad:
        # Pad value is irrelevant: the kernel masks slots >= N to -inf itself.
        loc_f = jnp.pad(loc_f, (0, pad))
    loc2d = loc_f.reshape(R, 128)

    block_bytes = n_slots * 4
    vmem_limit = int(min(48 * 2**20, max(16 * 2**20, 6 * block_bytes)))

    idxs = pl.pallas_call(
        functools.partial(_utility_topk_kernel, n_valid=N, K=K),
        out_shape=jax.ShapeDtypeStruct((1, K), jnp.int32),
        in_specs=[pl.BlockSpec((R, 128), lambda: (0, 0))],
        out_specs=pl.BlockSpec((1, K), lambda: (0, 0)),
        compiler_params=pltpu.CompilerParams(vmem_limit_bytes=vmem_limit),
    )(loc2d)

    return idxs[0]


if __name__ == "__main__":
    # UtilityFunction has no learnable parameters; its "config" is the utility
    # function (expectation) and acquisition_size.
    acquisition_size = 3

    key = jax.random.PRNGKey(0)
    k_loc, k_scale = jax.random.split(key)
    N = 16  # number of candidate points in the predictive distribution
    loc = jax.random.normal(k_loc, (N,), dtype=jnp.float32)
    scale = jax.nn.softplus(jax.random.normal(k_scale, (N,), dtype=jnp.float32))

    idxs = utility_function_policy(loc, scale, acquisition_size)
    idxs = jax.block_until_ready(idxs)

    # Reference: score = expectation(Normal(loc, scale)) = loc; topk along dim 0.
    ref_idxs = lax.top_k(loc, min(acquisition_size, N))[1].astype(jnp.int32)
    assert jnp.array_equal(idxs, ref_idxs), (idxs, ref_idxs)

    print("KERNEL_OK")
</pallas_src>

<mosaic_0001>
module attributes {stable_mosaic.version = 11 : i64} {
  func.func @_utility_topk_kernel(%arg0: memref<8x128xf32, #tpu.memory_space<vmem>>, %arg1: memref<1x3xi32, #tpu.memory_space<vmem>>) attributes {dimension_semantics = [], scalar_prefetch = 0 : i64, scratch_operands = 0 : i64, tpu.core_type = #tpu.core_type<tc>} {
    %0 = tpu.iota {dimensions = array<i32: 0>} : vector<8x128xi32>
    %1 = tpu.iota {dimensions = array<i32: 1>} : vector<8x128xi32>
    %c128_i32 = arith.constant 128 : i32
    %2 = vector.broadcast %c128_i32 : i32 to vector<8x128xi32>
    %3 = arith.muli %0, %2 : vector<8x128xi32>
    %4 = arith.addi %3, %1 : vector<8x128xi32>
    %5 = tpu.iota {dimensions = array<i32: 1>} : vector<1x3xi32>
    %c0 = arith.constant 0 : index
    %c0_0 = arith.constant 0 : index
    %6 = vector.load %arg0[%c0, %c0_0] : memref<8x128xf32, #tpu.memory_space<vmem>>, vector<8x128xf32>
    %c16_i32 = arith.constant 16 : i32
    %7 = vector.broadcast %c16_i32 : i32 to vector<8x128xi32>
    %8 = arith.cmpi sge, %4, %7 : vector<8x128xi32>
    %9 = arith.cmpf one, %6, %6 : vector<8x128xf32>
    %10 = arith.ori %8, %9 : vector<8x128xi1>
    %cst = arith.constant 0xFF800000 : f32
    %11 = vector.broadcast %cst : f32 to vector<8x128xf32>
    %12 = arith.select %10, %11, %6 : vector<8x128xi1>, vector<8x128xf32>
    %c0_i32 = arith.constant 0 : i32
    %13 = vector.broadcast %c0_i32 : i32 to vector<1x3xi32>
    %cst_1 = arith.constant dense<0xFF800000> : vector<8xf32>
    %14 = vector.multi_reduction <maximumf>, %12, %cst_1 [1] : vector<8x128xf32> to vector<8xf32>
    %15 = vector.shape_cast %14 : vector<8xf32> to vector<8x1xf32>
    %cst_2 = arith.constant dense<0xFF800000> : vector<1xf32>
    %16 = vector.multi_reduction <maximumf>, %15, %cst_2 [0] : vector<8x1xf32> to vector<1xf32>
    %17 = vector.shape_cast %16 : vector<1xf32> to vector<1x1xf32>
    %18 = vector.broadcast %17 : vector<1x1xf32> to vector<8x128xf32>
    %19 = arith.cmpf oeq, %12, %18 : vector<8x128xf32>
    %c1024_i32 = arith.constant 1024 : i32
    %20 = vector.broadcast %c1024_i32 : i32 to vector<8x128xi32>
    %21 = arith.select %19, %4, %20 : vector<8x128xi1>, vector<8x128xi32>
    %cst_3 = arith.constant dense<2147483647> : vector<8xi32>
    %22 = vector.multi_reduction <minsi>, %21, %cst_3 [1] : vector<8x128xi32> to vector<8xi32>
    %23 = vector.shape_cast %22 : vector<8xi32> to vector<8x1xi32>
    %cst_4 = arith.constant dense<2147483647> : vector<1xi32>
    %24 = vector.multi_reduction <minsi>, %23, %cst_4 [0] : vector<8x1xi32> to vector<1xi32>
    %25 = vector.shape_cast %24 : vector<1xi32> to vector<1x1xi32>
    %c0_i32_5 = arith.constant 0 : i32
    %26 = vector.broadcast %c0_i32_5 : i32 to vector<1x3xi32>
    %27 = arith.cmpi eq, %5, %26 : vector<1x3xi32>
    %28 = vector.shape_cast %25 : vector<1x1xi32> to vector<1x1xi32>
    %29 = vector.broadcast %28 : vector<1x1xi32> to vector<1x3xi32>
    %30 = arith.select %27, %29, %13 : vector<1x3xi1>, vector<1x3xi32>
    %31 = vector.broadcast %25 : vector<1x1xi32> to vector<8x128xi32>
    %32 = arith.cmpi eq, %4, %31 : vector<8x128xi32>
    %cst_6 = arith.constant 0xFF800000 : f32
    %33 = vector.broadcast %cst_6 : f32 to vector<8x128xf32>
    %34 = arith.select %32, %33, %12 : vector<8x128xi1>, vector<8x128xf32>
    %cst_7 = arith.constant dense<0xFF800000> : vector<8xf32>
    %35 = vector.multi_reduction <maximumf>, %34, %cst_7 [1] : vector<8x128xf32> to vector<8xf32>
    %36 = vector.shape_cast %35 : vector<8xf32> to vector<8x1xf32>
    %cst_8 = arith.constant dense<0xFF800000> : vector<1xf32>
    %37 = vector.multi_reduction <maximumf>, %36, %cst_8 [0] : vector<8x1xf32> to vector<1xf32>
    %38 = vector.shape_cast %37 : vector<1xf32> to vector<1x1xf32>
    %39 = vector.broadcast %38 : vector<1x1xf32> to vector<8x128xf32>
    %40 = arith.cmpf oeq, %34, %39 : vector<8x128xf32>
    %c1024_i32_9 = arith.constant 1024 : i32
    %41 = vector.broadcast %c1024_i32_9 : i32 to vector<8x128xi32>
    %42 = arith.select %40, %4, %41 : vector<8x128xi1>, vector<8x128xi32>
    %cst_10 = arith.constant dense<2147483647> : vector<8xi32>
    %43 = vector.multi_reduction <minsi>, %42, %cst_10 [1] : vector<8x128xi32> to vector<8xi32>
    %44 = vector.shape_cast %43 : vector<8xi32> to vector<8x1xi32>
    %cst_11 = arith.constant dense<2147483647> : vector<1xi32>
    %45 = vector.multi_reduction <minsi>, %44, %cst_11 [0] : vector<8x1xi32> to vector<1xi32>
    %46 = vector.shape_cast %45 : vector<1xi32> to vector<1x1xi32>
    %c1_i32 = arith.constant 1 : i32
    %47 = vector.broadcast %c1_i32 : i32 to vector<1x3xi32>
    %48 = arith.cmpi eq, %5, %47 : vector<1x3xi32>
    %49 = vector.shape_cast %46 : vector<1x1xi32> to vector<1x1xi32>
    %50 = vector.broadcast %49 : vector<1x1xi32> to vector<1x3xi32>
    %51 = arith.select %48, %50, %30 : vector<1x3xi1>, vector<1x3xi32>
    %52 = vector.broadcast %46 : vector<1x1xi32> to vector<8x128xi32>
    %53 = arith.cmpi eq, %4, %52 : vector<8x128xi32>
    %cst_12 = arith.constant 0xFF800000 : f32
    %54 = vector.broadcast %cst_12 : f32 to vector<8x128xf32>
    %55 = arith.select %53, %54, %34 : vector<8x128xi1>, vector<8x128xf32>
    %cst_13 = arith.constant dense<0xFF800000> : vector<8xf32>
    %56 = vector.multi_reduction <maximumf>, %55, %cst_13 [1] : vector<8x128xf32> to vector<8xf32>
    %57 = vector.shape_cast %56 : vector<8xf32> to vector<8x1xf32>
    %cst_14 = arith.constant dense<0xFF800000> : vector<1xf32>
    %58 = vector.multi_reduction <maximumf>, %57, %cst_14 [0] : vector<8x1xf32> to vector<1xf32>
    %59 = vector.shape_cast %58 : vector<1xf32> to vector<1x1xf32>
    %60 = vector.broadcast %59 : vector<1x1xf32> to vector<8x128xf32>
    %61 = arith.cmpf oeq, %55, %60 : vector<8x128xf32>
    %c1024_i32_15 = arith.constant 1024 : i32
    %62 = vector.broadcast %c1024_i32_15 : i32 to vector<8x128xi32>
    %63 = arith.select %61, %4, %62 : vector<8x128xi1>, vector<8x128xi32>
    %cst_16 = arith.constant dense<2147483647> : vector<8xi32>
    %64 = vector.multi_reduction <minsi>, %63, %cst_16 [1] : vector<8x128xi32> to vector<8xi32>
    %65 = vector.shape_cast %64 : vector<8xi32> to vector<8x1xi32>
    %cst_17 = arith.constant dense<2147483647> : vector<1xi32>
    %66 = vector.multi_reduction <minsi>, %65, %cst_17 [0] : vector<8x1xi32> to vector<1xi32>
    %67 = vector.shape_cast %66 : vector<1xi32> to vector<1x1xi32>
    %c2_i32 = arith.constant 2 : i32
    %68 = vector.broadcast %c2_i32 : i32 to vector<1x3xi32>
    %69 = arith.cmpi eq, %5, %68 : vector<1x3xi32>
    %70 = vector.shape_cast %67 : vector<1x1xi32> to vector<1x1xi32>
    %71 = vector.broadcast %70 : vector<1x1xi32> to vector<1x3xi32>
    %72 = arith.select %69, %71, %51 : vector<1x3xi1>, vector<1x3xi32>
    %c0_18 = arith.constant 0 : index
    %c0_19 = arith.constant 0 : index
    %73 = vector.load %arg1[%c0_18, %c0_19] : memref<1x3xi32, #tpu.memory_space<vmem>>, vector<1x3xi32>
    tpu.vector_store %arg1[%c0_18, %c0_19], %72 {strides = array<i32>} : memref<1x3xi32, #tpu.memory_space<vmem>>, vector<1x3xi32>,
    return
  }
}

</mosaic_0001>

<bundles_post_ra>
// kernel: tpu_custom_call.1
= control target key start
LH: loop header
LB: loop body
LE: loop exit
PB: predicated region body
PF: predicated region fallthrough
CT: control target
= control target key end

     0   :  { %6 = vsyncpa [#allocation3], 0  ;;  %s248_s0 = inlined_call_operand.hbm [shape: f32[8,128], index: 0, kind: input, shape index: {}]   ;;  %s249_s1 = inlined_call_operand.hbm [shape: s32[1,3], index: 1, kind: output, shape index: {}]  }
   0x1   :  { %7 = vsyncpa [#allocation4], 0  ;;  %s13_s8 = sshll.u32 %s248_s0, 4  ;;  %s216_s9 = smov [#allocation2]   ;;  %s14_s8 = int_to_ptr.hbm [resolvable:$true] %s13_s8 }
   0x2   :  { %s15_s10 = sshll.u32 %s216_s9, 4  ;;  %s16_s10 = int_to_ptr.vmem [resolvable:$true] %s15_s10 }
   0x3   :  { %18 = dma.hbm_to_vmem [thread:$0]  %s14_s8, 128, %s16_s10, [#allocation3]  }
   0x4   :  { %212 = dma.done.wait [#allocation3], 128  }
   0x5   :  { %213 = vsyncadd [#allocation3], 4294967168  ;;  %v23_v0 = vlaneseq  ;;  %v29_v5 = vld [vmem:[#allocation2] sm:$0xff]  ;;  %s217_s0 = smov [#allocation5]   ;;  %s152_s14 = sshll.u32 %s249_s1, 4  ;;  %s153_s14 = int_to_ptr.hbm [resolvable:$true] %s152_s14 }
   0x6   :  { %vm31_vm1 = vcmp.ne.f32.partialorder %v29_v5, %v29_v5  ;;  %s150_s11 = sshll.u32 %s217_s0, 4  ;;  %s151_s11 = int_to_ptr.vmem [resolvable:$true] %s150_s11 }
   0x7   :  { %v24_v1 = vshrl.u32 %v23_v0, 7  ;;  %v231_v2 = vand.u32 127, %v23_v0 }
   0x9   :  { %v27_v3 = vmul.u32 128, %v24_v1  ;;  %vm67_vm13 = vcmp.eq.s32.totalorder %v231_v2, 0  ;;  %vm104_vm14 = vcmp.eq.s32.totalorder %v231_v2, 1 }
   0xb   :  { %v234_v4 = vadd.s32 %v27_v3, %v231_v2 }
   0xd   :  { %vm30_vm0 = vcmp.ge.s32.totalorder %v234_v4, 16 }
   0xe   :  { %vm32_vm2 = vmor %vm30_vm0, %vm31_vm1 }
   0xf   :  { %v33_v6 = vsel %vm32_vm2, -inf, %v29_v5 }
  0x10   :  { %34 = vmax.xlane.f32.xlu0 %v33_v6 }
  0x83   :  { %v35_v7 = vpop.xlane.xlu0 %34 }
  0x84   :  { %v36_v8 = vrot.slane %v35_v7, 4 }
  0x86   :  { %v37_v9 = vmax.f32 %v35_v7, %v36_v8 }
  0x88   :  { %v38_v10 = vrot.slane %v37_v9, 2 }
  0x8a   :  { %v39_v11 = vmax.f32 %v37_v9, %v38_v10 }
  0x8c   :  { %v40_v12 = vrot.slane %v39_v11, 1 }
  0x8e   :  { %v41_v13 = vmax.f32 %v39_v11, %v40_v12 }
  0x90   :  { %vm42_vm3 = vcmp.eq.f32.partialorder %v33_v6, %v41_v13 }
  0x91   :  { %v43_v14 = vsel %vm42_vm3, %v234_v4, 1024 }
  0x92   :  { %v45_v15 = vshra.s32 %v43_v14, 16  ;;  %v44_v17 = vand.u32 65535, %v43_v14 }
  0x94   :  { %v47_v16 = vcvt.s32.f32 %v45_v15  ;;  %v46_v19 = vcvt.s32.f32 %v44_v17 }
  0x96   :  { %48 = vmin.xlane.f32.xlu0 %v47_v16 }
 0x109   :  { %v49_v18 = vpop.xlane.xlu0 %48 }
 0x10a   :  { %vm50_vm4 = vcmp.eq.f32.partialorder %v47_v16, %v49_v18  ;;  %v55_v21 = vcvt.f32.s32 %v49_v18 }
 0x10b   :  { %v51_v20 = vsel %vm50_vm4, %v46_v19, inf }
 0x10c   :  { %52 = vmin.xlane.f32.xlu1 %v51_v20  ;;  %v56_v23 = vshll.u32 %v55_v21, 16 }
 0x17f   :  { %v53_v22 = vpop.xlane.xlu1 %52 }
 0x180   :  { %v54_v24 = vcvt.f32.s32 %v53_v22 }
 0x182   :  { %v57_v25 = vadd.s32 %v56_v23, %v54_v24 }
 0x184   :  { %v58_v26 = vrot.slane %v57_v25, 4 }
 0x186   :  { %vm59_vm5 = vcmp.lt.s32.totalorder %v57_v25, %v58_v26 }
 0x187   :  { %v60_v27 = vsel %vm59_vm5, %v57_v25, %v58_v26  ;;  %vm141_vm5 = vcmp.eq.s32.totalorder %v231_v2, 2 }
 0x188   :  { %v61_v28 = vrot.slane %v60_v27, 2 }
 0x18a   :  { %vm62_vm6 = vcmp.lt.s32.totalorder %v60_v27, %v61_v28 }
 0x18b   :  { %v63_v29 = vsel %vm62_vm6, %v60_v27, %v61_v28 }
 0x18c   :  { %v64_v30 = vrot.slane %v63_v29, 1 }
 0x18e   :  { %vm65_vm7 = vcmp.lt.s32.totalorder %v63_v29, %v64_v30 }
 0x18f   :  { %v66_v31 = vsel %vm65_vm7, %v63_v29, %v64_v30  ;;  %vm143_vm7 = vcmask 16384  }
 0x190   :  { %vm69_vm8 = vcmp.eq.s32.totalorder %v234_v4, %v66_v31  ;;  %v68_v57 = vsel %vm67_vm13, %v66_v31, 0 }
 0x191   :  { %v70_v32 = vsel %vm69_vm8, -inf, %v33_v6 }
 0x192   :  { %71 = vmax.xlane.f32.xlu1 %v70_v32 }
 0x205   :  { %v72_v33 = vpop.xlane.xlu1 %71 }
 0x206   :  { %v73_v34 = vrot.slane %v72_v33, 4 }
 0x208   :  { %v74_v35 = vmax.f32 %v72_v33, %v73_v34 }
 0x20a   :  { %v75_v36 = vrot.slane %v74_v35, 2 }
 0x20c   :  { %v76_v37 = vmax.f32 %v74_v35, %v75_v36 }
 0x20e   :  { %v77_v38 = vrot.slane %v76_v37, 1 }
 0x210   :  { %v78_v39 = vmax.f32 %v76_v37, %v77_v38 }
 0x212   :  { %vm79_vm9 = vcmp.eq.f32.partialorder %v70_v32, %v78_v39 }
 0x213   :  { %v80_v40 = vsel %vm79_vm9, %v234_v4, 1024 }
 0x214   :  { %v82_v41 = vshra.s32 %v80_v40, 16  ;;  %v81_v43 = vand.u32 65535, %v80_v40 }
 0x216   :  { %v84_v42 = vcvt.s32.f32 %v82_v41  ;;  %v83_v45 = vcvt.s32.f32 %v81_v43 }
 0x218   :  { %85 = vmin.xlane.f32.xlu2 %v84_v42 }
 0x28b   :  { %v86_v44 = vpop.xlane.xlu2 %85 }
 0x28c   :  { %vm87_vm10 = vcmp.eq.f32.partialorder %v84_v42, %v86_v44  ;;  %v92_v47 = vcvt.f32.s32 %v86_v44 }
 0x28d   :  { %v88_v46 = vsel %vm87_vm10, %v83_v45, inf }
 0x28e   :  { %89 = vmin.xlane.f32.xlu2 %v88_v46  ;;  %v93_v49 = vshll.u32 %v92_v47, 16 }
 0x301   :  { %v90_v48 = vpop.xlane.xlu2 %89 }
 0x302   :  { %v91_v50 = vcvt.f32.s32 %v90_v48 }
 0x304   :  { %v94_v51 = vadd.s32 %v93_v49, %v91_v50 }
 0x306   :  { %v95_v52 = vrot.slane %v94_v51, 4 }
 0x308   :  { %vm96_vm11 = vcmp.lt.s32.totalorder %v94_v51, %v95_v52 }
 0x309   :  { %v97_v53 = vsel %vm96_vm11, %v94_v51, %v95_v52 }
 0x30a   :  { %v98_v54 = vrot.slane %v97_v53, 2 }
 0x30c   :  { %vm99_vm12 = vcmp.lt.s32.totalorder %v97_v53, %v98_v54 }
 0x30d   :  { %v100_v55 = vsel %vm99_vm12, %v97_v53, %v98_v54 }
 0x30e   :  { %v101_v56 = vrot.slane %v100_v55, 1 }
 0x310   :  { %vm102_vm15 = vcmp.lt.s32.totalorder %v100_v55, %v101_v56 }
 0x311   :  { %v103_v58 = vsel %vm102_vm15, %v100_v55, %v101_v56 }
 0x312   :  { %vm106_vm0 = vcmp.eq.s32.totalorder %v234_v4, %v103_v58  ;;  %v105_v59 = vsel %vm104_vm14, %v103_v58, %v68_v57 }
 0x313   :  { %v107_v60 = vsel %vm106_vm0, -inf, %v70_v32 }
 0x314   :  { %108 = vmax.xlane.f32.xlu0 %v107_v60 }
 0x387   :  { %v109_v61 = vpop.xlane.xlu0 %108 }
 0x388   :  { %v110_v62 = vrot.slane %v109_v61, 4 }
 0x38a   :  { %v111_v63 = vmax.f32 %v109_v61, %v110_v62 }
 0x38c   :  { %v112_v0 = vrot.slane %v111_v63, 2 }
 0x38e   :  { %v113_v1 = vmax.f32 %v111_v63, %v112_v0 }
 0x390   :  { %v114_v3 = vrot.slane %v113_v1, 1 }
 0x392   :  { %v115_v5 = vmax.f32 %v113_v1, %v114_v3 }
 0x394   :  { %vm116_vm1 = vcmp.eq.f32.partialorder %v107_v60, %v115_v5 }
 0x395   :  { %v117_v6 = vsel %vm116_vm1, %v234_v4, 1024 }
 0x396   :  { %v119_v7 = vshra.s32 %v117_v6, 16  ;;  %v118_v9 = vand.u32 65535, %v117_v6 }
 0x398   :  { %v121_v8 = vcvt.s32.f32 %v119_v7  ;;  %v120_v11 = vcvt.s32.f32 %v118_v9 }
 0x39a   :  { %122 = vmin.xlane.f32.xlu1 %v121_v8 }
 0x40d   :  { %v123_v10 = vpop.xlane.xlu1 %122 }
 0x40e   :  { %vm124_vm2 = vcmp.eq.f32.partialorder %v121_v8, %v123_v10  ;;  %v129_v13 = vcvt.f32.s32 %v123_v10 }
 0x40f   :  { %v125_v12 = vsel %vm124_vm2, %v120_v11, inf }
 0x410   :  { %126 = vmin.xlane.f32.xlu2 %v125_v12  ;;  %v130_v15 = vshll.u32 %v129_v13, 16 }
 0x483   :  { %v127_v14 = vpop.xlane.xlu2 %126 }
 0x484   :  { %v128_v16 = vcvt.f32.s32 %v127_v14 }
 0x486   :  { %v131_v17 = vadd.s32 %v130_v15, %v128_v16 }
 0x488   :  { %v132_v18 = vrot.slane %v131_v17, 4 }
 0x48a   :  { %vm133_vm3 = vcmp.lt.s32.totalorder %v131_v17, %v132_v18 }
 0x48b   :  { %v134_v19 = vsel %vm133_vm3, %v131_v17, %v132_v18 }
 0x48c   :  { %v135_v20 = vrot.slane %v134_v19, 2 }
 0x48e   :  { %vm136_vm4 = vcmp.lt.s32.totalorder %v134_v19, %v135_v20 }
 0x48f   :  { %v137_v4 = vsel %vm136_vm4, %v134_v19, %v135_v20 }
 0x490   :  { %v138_v21 = vrot.slane %v137_v4, 1 }
 0x492   :  { %vm139_vm6 = vcmp.lt.s32.totalorder %v137_v4, %v138_v21 }
 0x493   :  { %v140_v22 = vsel %vm139_vm6, %v137_v4, %v138_v21 }
 0x494   :  { %v142_v23 = vsel %vm141_vm5, %v140_v22, %v105_v59 }
 0x495   :  { %144 = vst.msk [vmem:[#allocation5] sm:$0x1] %vm143_vm7, %v142_v23 }
 0x496   :  { %155 = dma.vmem_to_hbm [thread:$0]  %s151_s11, 16, %s153_s14, [#allocation4]  }
 0x497   :  { %214 = dma.done.wait [#allocation4], 16  }
 0x498   :  { %215 = vsyncadd [#allocation4], 4294967280 }
 0x499   :  { %160 = vsyncpa [#allocation3], 1 }
 0x49a   :  { %161 = vsyncpa [#allocation4], 1 }

</bundles_post_ra>
